<compile_context>
chip_gen: v5e
topology: v5e:2x2
jax: 0.10.0
libtpu: 0.0.40
codegen_flags: <defaults>
</compile_context>

<pallas_src>
import functools

import jax
import jax.numpy as jnp
from jax.experimental import pallas as pl
from jax.experimental.pallas import tpu as pltpu


# ----------------------------- kernel helpers ------------------------------

def _sigmoid(x):
    # exp -> EUP; reciprocal also rides the EUP slot instead of a VALU divide.
    return pl.reciprocal(1.0 + jnp.exp(-x), approx=False)


def _excite(y_col, w1, w2):
    """y_col: (C, 1) mean.  Returns (C, 1) gate in [0, 1]."""
    h = jnp.dot(w1, y_col, preferred_element_type=jnp.float32)   # (Cr, 1)
    h = h * _sigmoid(h)                                           # SiLU
    z = jnp.dot(w2, h, preferred_element_type=jnp.float32)        # (C, 1)
    return _sigmoid(z)


# ------------------------------- the kernels --------------------------------

def _se_fused_kernel(x_ref, w1_ref, w2_ref, o_ref, *, inv_len):
    """One batch element, whole (C, L) block resident in VMEM (x read once)."""
    x = x_ref[0]                                                  # (C, L) f32
    y = jnp.sum(x, axis=-1, keepdims=True) * inv_len              # (C, 1) mean
    gate = _excite(y, w1_ref[...], w2_ref[...])                   # (C, 1)
    o_ref[0] = (x * gate).astype(o_ref.dtype)                     # lane bcast


def _se_squeeze_kernel(x_ref, w1_ref, w2_ref, s_ref, *, inv_len):
    """Pass 1: tiled reduction over L, then the excitation MLP on the last tile.

    The (1, C, 1) output block has the same index for every L tile, so it stays
    VMEM-resident across the reduction ("arbitrary" axis) and is used as the
    accumulator directly (no extra scratch)."""
    l = pl.program_id(1)

    @pl.when(l == 0)
    def _():
        s_ref[...] = jnp.zeros_like(s_ref)

    s_ref[0] += jnp.sum(x_ref[0], axis=-1, keepdims=True)         # (C, 1)

    @pl.when(l == pl.num_programs(1) - 1)
    def _():
        y = s_ref[0] * inv_len                                    # mean
        s_ref[0] = _excite(y, w1_ref[...], w2_ref[...])


def _se_scale_kernel(x_ref, s_ref, o_ref):
    """Pass 2: broadcast the per-(batch, channel) gate over the length tiles."""
    o_ref[0] = (x_ref[0] * s_ref[0]).astype(o_ref.dtype)


# ------------------------------- the wrapper --------------------------------

def _pick_l_tile(L, max_tile=2048):
    """Largest multiple of 128 (<= max_tile) that divides L; else whole L."""
    t = min(max_tile, L)
    t -= t % 128
    while t >= 128:
        if L % t == 0:
            return t
        t -= 128
    return L


def se_layer_forward(x, w1, w2, *, l_tile=None):
    """x: (B, C, L) float32 (PyTorch NCL).  w1: (C//r, C).  w2: (C, C//r)."""
    B, C, L = x.shape
    Cr = w1.shape[0]
    assert w1.shape == (Cr, C) and w2.shape == (C, Cr), (w1.shape, w2.shape)
    x = x.astype(jnp.float32)
    w1 = w1.astype(jnp.float32)
    w2 = w2.astype(jnp.float32)
    inv_len = 1.0 / float(L)

    if l_tile is None:
        # Whole-L block per batch element if it comfortably fits VMEM
        # (double-buffered in + out blocks), otherwise tile L.
        l_tile = L if C * L * 4 <= (8 << 20) else _pick_l_tile(L)

    if l_tile >= L:
        # ---------------- fused single-pass path (x read once) -------------
        return pl.pallas_call(
            functools.partial(_se_fused_kernel, inv_len=inv_len),
            out_shape=jax.ShapeDtypeStruct((B, C, L), x.dtype),
            grid=(B,),
            in_specs=[
                pl.BlockSpec((1, C, L), lambda b: (b, 0, 0)),
                pl.BlockSpec((Cr, C), lambda b: (0, 0)),
                pl.BlockSpec((C, Cr), lambda b: (0, 0)),
            ],
            out_specs=pl.BlockSpec((1, C, L), lambda b: (b, 0, 0)),
            compiler_params=pltpu.CompilerParams(
                dimension_semantics=("parallel",)),
        )(x, w1, w2)

    # -------------------- tiled two-pass path (bounded VMEM) ---------------
    assert L % l_tile == 0 and l_tile % 128 == 0, (L, l_tile)
    nl = L // l_tile

    gate = pl.pallas_call(
        functools.partial(_se_squeeze_kernel, inv_len=inv_len),
        out_shape=jax.ShapeDtypeStruct((B, C, 1), jnp.float32),
        grid=(B, nl),
        in_specs=[
            pl.BlockSpec((1, C, l_tile), lambda b, l: (b, 0, l)),
            pl.BlockSpec((Cr, C), lambda b, l: (0, 0)),
            pl.BlockSpec((C, Cr), lambda b, l: (0, 0)),
        ],
        out_specs=pl.BlockSpec((1, C, 1), lambda b, l: (b, 0, 0)),
        compiler_params=pltpu.CompilerParams(
            dimension_semantics=("parallel", "arbitrary")),
    )(x, w1, w2)

    return pl.pallas_call(
        _se_scale_kernel,
        out_shape=jax.ShapeDtypeStruct((B, C, L), x.dtype),
        grid=(B, nl),
        in_specs=[
            pl.BlockSpec((1, C, l_tile), lambda b, l: (b, 0, l)),
            pl.BlockSpec((1, C, 1), lambda b, l: (b, 0, 0)),
        ],
        out_specs=pl.BlockSpec((1, C, l_tile), lambda b, l: (b, 0, l)),
        compiler_params=pltpu.CompilerParams(
            dimension_semantics=("parallel", "parallel")),
    )(x, gate)


# ------------------------------- reference ----------------------------------

def ref_se_layer(x, w1, w2):
    y = jnp.mean(x, axis=-1)                    # (B, C)
    h = y @ w1.T                                # (B, Cr)
    h = h * jax.nn.sigmoid(h)                   # SiLU
    z = h @ w2.T                                # (B, C)
    s = jax.nn.sigmoid(z)
    return x * s[:, :, None]


# ----------------------------------- main ------------------------------------

if __name__ == "__main__":
    B, C, RED, L = 2, 32, 4, 256
    Cr = C // RED

    key = jax.random.PRNGKey(0)
    kx, k1, k2 = jax.random.split(key, 3)
    x = jax.random.normal(kx, (B, C, L), jnp.float32)          # PyTorch NCL
    w1 = jax.random.normal(k1, (Cr, C), jnp.float32) / jnp.sqrt(C)
    w2 = jax.random.normal(k2, (C, Cr), jnp.float32) / jnp.sqrt(Cr)

    # Tiled two-pass path (forced tile so the reduction pipeline is exercised).
    out_tiled = jax.block_until_ready(se_layer_forward(x, w1, w2, l_tile=128))
    ref = ref_se_layer(x, w1, w2)
    assert out_tiled.shape == (B, C, L), out_tiled.shape
    assert jnp.allclose(out_tiled, ref, atol=1e-4, rtol=1e-4), (
        "tiled mismatch", float(jnp.max(jnp.abs(out_tiled - ref))))

    # Fused single-pass path (auto-selected for small slabs).
    out_fused = jax.block_until_ready(se_layer_forward(x, w1, w2))
    assert jnp.allclose(out_fused, ref, atol=1e-4, rtol=1e-4), (
        "fused mismatch", float(jnp.max(jnp.abs(out_fused - ref))))

    print("KERNEL_OK")
</pallas_src>

<mosaic_0001>
module attributes {stable_mosaic.version = 11 : i64} {
  func.func @_se_squeeze_kernel(%arg0: i32, %arg1: i32, %arg2: memref<1x32x128xf32, #tpu.memory_space<vmem>>, %arg3: memref<8x32xf32, #tpu.memory_space<vmem>>, %arg4: memref<32x8xf32, #tpu.memory_space<vmem>>, %arg5: memref<1x32x1xf32, #tpu.memory_space<vmem>>) attributes {dimension_semantics = [#tpu.dimension_semantics<parallel>, #tpu.dimension_semantics<arbitrary>], iteration_bounds = array<i64: 2, 2>, scalar_prefetch = 0 : i64, scratch_operands = 0 : i64, tpu.core_type = #tpu.core_type<tc>, window_params = [{transform_indices = @transform_0, window_bounds = array<i64: 1, 32, 128>}, {pipeline_mode = #tpu.pipeline_mode<synchronous>, transform_indices = @transform_1, window_bounds = array<i64: 8, 32>}, {pipeline_mode = #tpu.pipeline_mode<synchronous>, transform_indices = @transform_2, window_bounds = array<i64: 32, 8>}, {transform_indices = @transform_3, window_bounds = array<i64: 1, 32, 1>}]} {
    %c0_i32 = arith.constant 0 : i32
    %0 = arith.cmpi eq, %arg1, %c0_i32 : i32
    %1 = arith.extui %0 : i1 to i32
    %c0_i32_0 = arith.constant 0 : i32
    %2 = arith.cmpi ne, %1, %c0_i32_0 : i32
    scf.if %2 {
      %cst_10 = arith.constant 0.000000e+00 : f32
      %16 = vector.broadcast %cst_10 : f32 to vector<1x32x1xf32>
      %c0_11 = arith.constant 0 : index
      %c0_12 = arith.constant 0 : index
      %c0_13 = arith.constant 0 : index
      %17 = vector.load %arg5[%c0_11, %c0_12, %c0_13] : memref<1x32x1xf32, #tpu.memory_space<vmem>>, vector<1x32x1xf32>
      tpu.vector_store %arg5[%c0_11, %c0_12, %c0_13], %16 {strides = array<i32>} : memref<1x32x1xf32, #tpu.memory_space<vmem>>, vector<1x32x1xf32>,
    } else {
    }
    %c0 = arith.constant 0 : index
    %c0_1 = arith.constant 0 : index
    %c0_2 = arith.constant 0 : index
    %3 = vector.load %arg5[%c0, %c0_1, %c0_2] : memref<1x32x1xf32, #tpu.memory_space<vmem>>, vector<1x32x1xf32>
    %4 = vector.shape_cast %3 : vector<1x32x1xf32> to vector<32x1xf32>
    %c0_3 = arith.constant 0 : index
    %c0_4 = arith.constant 0 : index
    %c0_5 = arith.constant 0 : index
    %5 = vector.load %arg2[%c0_3, %c0_4, %c0_5] : memref<1x32x128xf32, #tpu.memory_space<vmem>>, vector<1x32x128xf32>
    %6 = vector.shape_cast %5 : vector<1x32x128xf32> to vector<32x128xf32>
    %cst = arith.constant dense<0.000000e+00> : vector<32xf32>
    %7 = vector.multi_reduction <add>, %6, %cst [1] : vector<32x128xf32> to vector<32xf32>
    %8 = vector.shape_cast %7 : vector<32xf32> to vector<32x1xf32>
    %9 = arith.addf %4, %8 : vector<32x1xf32>
    %c0_6 = arith.constant 0 : index
    %c0_7 = arith.constant 0 : index
    %c0_8 = arith.constant 0 : index
    %10 = vector.load %arg5[%c0_6, %c0_7, %c0_8] : memref<1x32x1xf32, #tpu.memory_space<vmem>>, vector<1x32x1xf32>
    %11 = vector.shape_cast %10 : vector<1x32x1xf32> to vector<32x1xf32>
    %12 = vector.shape_cast %9 : vector<32x1xf32> to vector<1x32x1xf32>
    tpu.vector_store %arg5[%c0_6, %c0_7, %c0_8], %12 {strides = array<i32>} : memref<1x32x1xf32, #tpu.memory_space<vmem>>, vector<1x32x1xf32>,
    %c1_i32 = arith.constant 1 : i32
    %13 = arith.cmpi eq, %arg1, %c1_i32 : i32
    %14 = arith.extui %13 : i1 to i32
    %c0_i32_9 = arith.constant 0 : i32
    %15 = arith.cmpi ne, %14, %c0_i32_9 : i32
    scf.if %15 {
      %c0_10 = arith.constant 0 : index
      %c0_11 = arith.constant 0 : index
      %c0_12 = arith.constant 0 : index
      %16 = vector.load %arg5[%c0_10, %c0_11, %c0_12] : memref<1x32x1xf32, #tpu.memory_space<vmem>>, vector<1x32x1xf32>
      %17 = vector.shape_cast %16 : vector<1x32x1xf32> to vector<32x1xf32>
      %cst_13 = arith.constant 3.906250e-03 : f32
      %18 = vector.broadcast %cst_13 : f32 to vector<32x1xf32>
      %19 = arith.mulf %17, %18 : vector<32x1xf32>
      %c0_14 = arith.constant 0 : index
      %c0_15 = arith.constant 0 : index
      %20 = vector.load %arg3[%c0_14, %c0_15] : memref<8x32xf32, #tpu.memory_space<vmem>>, vector<8x32xf32>
      %c0_16 = arith.constant 0 : index
      %c0_17 = arith.constant 0 : index
      %21 = vector.load %arg4[%c0_16, %c0_17] : memref<32x8xf32, #tpu.memory_space<vmem>>, vector<32x8xf32>
      %cst_18 = arith.constant dense<0.000000e+00> : vector<8x1xf32>
      %22 = tpu.matmul %20, %19, %cst_18 {dimension_numbers = #tpu.dot_dimension_numbers<[1], [0], [0], [1], [0, 0, 1, 1], [], []>} : vector<8x32xf32>, vector<32x1xf32>, vector<8x1xf32> -> vector<8x1xf32>
      %cst_19 = arith.constant 0.000000e+00 : f32
      %23 = vector.broadcast %cst_19 : f32 to vector<8x1xf32>
      %24 = arith.subf %23, %22 : vector<8x1xf32>
      %25 = math.exp %24 : vector<8x1xf32>
      %cst_20 = arith.constant 1.000000e+00 : f32
      %26 = vector.broadcast %cst_20 : f32 to vector<8x1xf32>
      %27 = arith.addf %26, %25 : vector<8x1xf32>
      %28 = tpu.reciprocal %27 : vector<8x1xf32> -> vector<8x1xf32>
      %29 = arith.mulf %22, %28 : vector<8x1xf32>
      %cst_21 = arith.constant dense<0.000000e+00> : vector<32x1xf32>
      %30 = tpu.matmul %21, %29, %cst_21 {dimension_numbers = #tpu.dot_dimension_numbers<[1], [0], [0], [1], [0, 0, 1, 1], [], []>} : vector<32x8xf32>, vector<8x1xf32>, vector<32x1xf32> -> vector<32x1xf32>
      %cst_22 = arith.constant 0.000000e+00 : f32
      %31 = vector.broadcast %cst_22 : f32 to vector<32x1xf32>
      %32 = arith.subf %31, %30 : vector<32x1xf32>
      %33 = math.exp %32 : vector<32x1xf32>
      %cst_23 = arith.constant 1.000000e+00 : f32
      %34 = vector.broadcast %cst_23 : f32 to vector<32x1xf32>
      %35 = arith.addf %34, %33 : vector<32x1xf32>
      %36 = tpu.reciprocal %35 : vector<32x1xf32> -> vector<32x1xf32>
      %c0_24 = arith.constant 0 : index
      %c0_25 = arith.constant 0 : index
      %c0_26 = arith.constant 0 : index
      %37 = vector.load %arg5[%c0_24, %c0_25, %c0_26] : memref<1x32x1xf32, #tpu.memory_space<vmem>>, vector<1x32x1xf32>
      %38 = vector.shape_cast %37 : vector<1x32x1xf32> to vector<32x1xf32>
      %39 = vector.shape_cast %36 : vector<32x1xf32> to vector<1x32x1xf32>
      tpu.vector_store %arg5[%c0_24, %c0_25, %c0_26], %39 {strides = array<i32>} : memref<1x32x1xf32, #tpu.memory_space<vmem>>, vector<1x32x1xf32>,
    } else {
    }
    return
  }
  func.func @transform_0(%arg0: i32, %arg1: i32) -> (i32, i32, i32) {
    %c0_i32 = arith.constant 0 : i32
    %c0_i32_0 = arith.constant 0 : i32
    return %arg0, %c0_i32, %arg1 : i32, i32, i32
  }
  func.func @transform_1(%arg0: i32, %arg1: i32) -> (i32, i32) {
    %c0_i32 = arith.constant 0 : i32
    %c0_i32_0 = arith.constant 0 : i32
    %c0_i32_1 = arith.constant 0 : i32
    return %c0_i32, %c0_i32_0 : i32, i32
  }
  func.func @transform_2(%arg0: i32, %arg1: i32) -> (i32, i32) {
    %c0_i32 = arith.constant 0 : i32
    %c0_i32_0 = arith.constant 0 : i32
    %c0_i32_1 = arith.constant 0 : i32
    return %c0_i32, %c0_i32_0 : i32, i32
  }
  func.func @transform_3(%arg0: i32, %arg1: i32) -> (i32, i32, i32) {
    %c0_i32 = arith.constant 0 : i32
    %c0_i32_0 = arith.constant 0 : i32
    %c0_i32_1 = arith.constant 0 : i32
    return %arg0, %c0_i32, %c0_i32_0 : i32, i32, i32
  }
}

</mosaic_0001>

<bundles_post_ra>
// kernel: tpu_custom_call.1
= control target key start
LH: loop header
LB: loop body
LE: loop exit
PB: predicated region body
PF: predicated region fallthrough
CT: control target
= control target key end

     0   :  { %8 = vsyncpa [#allocation3], 0  ;;  %s901_s0 = inlined_call_operand.hbm [shape: f32[2,32,256], index: 0, kind: input, shape index: {}]   ;;  %s902_s1 = inlined_call_operand.vmem [shape: f32[8,32], index: 1, kind: input, shape index: {}]   ;;  %s903_s2 = inlined_call_operand.vmem [shape: f32[32,8], index: 2, kind: input, shape index: {}]   ;;  %s904_s3 = inlined_call_operand.vmem [shape: f32[2,32,1], index: 3, kind: output, shape index: {}]  }
   0x1   :  { %10 = vsyncpa [#allocation3 + $0x1], 0  ;;  %s740_s12 = smov 0   ;;  %s742_s13 = smov 0  }
   0x2   :  { %s744_s14 = smov 0   ;;  %s746_s15 = smov 0  }
   0x3   :  { %s748_s16 = smov 0   ;;  %s750_s17 = smov 0  }
   0x4   :  { %s752_s18 = smov 0   ;;  %s754_s19 = smov 0  }
   0x5 LB: > { %s500_s20 = sadd.s32 4294967295, %s714_s19   ;;  %s25_s21 = sadd.s32 1, %s706_s17  ;;  %s714_s19 = sphi %s754_s19, %s16_s19   ;;  %s710_s18 = sphi %s752_s18, %s913_s18   ;;  %s706_s17 = sphi %s750_s17, %s912_s17   ;;  %s702_s16 = sphi %s748_s16, %s911_s16   ;;  %s698_s15 = sphi %s746_s15, %s910_s15   ;;  %s694_s14 = sphi %s744_s14, %s909_s14   ;;  %s690_s13 = sphi %s742_s13, %s908_s13   ;;  %s686_s12 = sphi %s740_s12, %s907_s12  }
   0x6   : > { %p26_p0 = scmp.ge.s32.totalorder %s25_s21, 2  ;;  %s28_s22 = sadd.s32 1, %s710_s18 }
   0x7   : > { %s37_s23 = sadd.s32 1, %s694_s14  ;;  %p44_p1 = scmp.ne.s32.totalorder %s694_s14, %s690_s13 }
   0x8   : > { %s915_s21 = smov (%p26_p0, %s25_s21), 0  ;;  %s917_s22 = smov (!%p26_p0, %s28_s22), %s710_s18 }
   0x9   : > { %s33_s24 = ssub.s32 %s706_s17, %s915_s21  ;;  %p45_p2 = scmp.eq.s32.totalorder %s714_s19, 0 }
   0xa   : > { %p30_p3 = scmp.ge.s32.totalorder %s917_s22, 2  ;;  %p50_p4 = scmp.ne.s32.totalorder %s690_s13, %s686_s12 }
   0xb   : > { %p791_p5 = por %p45_p2, %p44_p1  ;;  %p51_p6 = scmp.eq.s32.totalorder %s500_s20, 0 }
   0xc   : > { %s919_s22 = smov (%p30_p3, %s917_s22), 0  ;;  %p529_p8 = scmp.lt.s32.totalorder %s714_s19, 4 }
   0xd   : > { %p797_p7 = por %p51_p6, %p50_p4  ;;  %s32_s27 = ssub.s32 %s710_s18, %s919_s22 }
   0xe   : > { %s34_s28 = sor.u32 %s33_s24, %s32_s27  ;;  %s148_s29 = sand.u32 1, %s694_s14  }
   0xf   : > { %p35_p9 = scmp.eq.s32.totalorder %s34_s28, 0  ;;  %s504_s30 = sshll.u32 %s148_s29, 5 }
  0x10   : > { %s505_s4 = sshll.u32 %s710_s18, 3  ;;  %s152_s8 = scalar_lea.vmem [#allocation2], %s504_s30 }
  0x11   : > { %s807_s5 = scalar_select %p35_p9, %s694_s14, %s37_s23  }
  0x12   : > { %s156_s6 = sadd.s32 %s706_s17, %s505_s4  ;;  %s161_s9 = sshll.u32 %s152_s8, 4  ;;  %s162_s9 = int_to_ptr.vmem [resolvable:$true] %s161_s9 }
  0x13   : > { %s506_s7 = sshll.u32 %s156_s6, 3  ;;  %p526_p10 = pnand %p529_p8, %p791_p5 }
  0x14   : > { %s158_s12 = scalar_lea.hbm %s901_s0, %s506_s7  ;;  %p507_p11 = scmp.ge.s32.totalorder %s714_s19, 1 }
  0x15   : > { %s159_s20 = sshll.u32 %s158_s12, 4  ;;  %s149_s24 = scalar_lea.sflag [#allocation3], %s148_s29  ;;  %s160_s20 = int_to_ptr.hbm [resolvable:$true] %s159_s20 }
  0x16   : > { %s716_s27 = smov 256   ;;  %s717_s23 = smov 128  }
  0x17   : > { %s718_s28 = smov 8   ;;  %p169_p12 = scmp.lt.s32.totalorder %s714_s19, 5 }
  0x18   : > { %528 = dma.hbm_to_vmem [thread:$0]  (!%p526_p10), %s160_s20, 512, %s162_s9, %s149_s24, %s716_s27, %s717_s23, %s718_s28  }
  0x19   : > { %p170_p13 = pnand %p507_p11, %p169_p12 }
  0x1a   : > { %s175_s30 = sand.u32 (!%p170_p13), 1, %s690_s13  }
  0x1b   : > { %173 = sbr.rel (%p170_p13) target bundleno = 522 (0x20a), region = 32  ;;  %s508_s4 = sshll.u32 (!%p170_p13), %s175_s30, 5 }
  0x1c   : > { %s176_s6 = scalar_lea.sflag (!%p170_p13), [#allocation3], %s175_s30  ;;  %s179_s7 = scalar_lea.vmem (!%p170_p13), [#allocation2], %s508_s4 }
  0x20   : > { %681 = dma.done.wait (%p797_p7), %s176_s6, 512  }
  0x21   : > { %683 = vsyncadd (%p797_p7), %s176_s6, 4294966784  ;;  %p203_p0 = scmp.lt.s32.totalorder %s702_s16, 1  ;;  %p511_p1 = scmp.ne.s32.totalorder %s698_s15, 0 }
  0x23   : > { %s921_s16 = smov (!%p203_p0, %s702_s16), 1  ;;  %211 = sbr.rel (%p511_p1) target bundleno = 45 (0x2d), region = 40 }
  0x24   : > { %s520_s25 = sshll.u32 %s921_s16, 5 }
  0x25   : > { %s829_s9 = scalar_lea.vmem %s904_s3, %s520_s25 }
  0x28   : > { %vm212_vm0 = vcmask 7168   ;;  %v719_v0 = vmov 0.0  }
  0x29   : > { %213 = vst.msk [vmem:[%s829_s9] sm:$0xff] %vm212_vm0, %v719_v0 }
  0x2a   : > { %214 = vst.msk [vmem:[%s829_s9 + $0x8] sm:$0xff] %vm212_vm0, %v719_v0 }
  0x2b   : > { %215 = vst.msk [vmem:[%s829_s9 + $0x10] sm:$0xff] %vm212_vm0, %v719_v0 }
  0x2c   : > { %216 = vst.msk [vmem:[%s829_s9 + $0x18] sm:$0xff] %vm212_vm0, %v719_v0 }
  0x2d PF: > { %v223_v1 = vld [vmem:[%s179_s7 + $0x10] sm:$0xff]  ;;  %v221_v2 = vld [vmem:[%s179_s7] sm:$0xff]  ;;  %v224_v3 = vld [vmem:[%s179_s7 + $0x18] sm:$0xff]  ;;  %vm237_vm1 = vcmask 7168   ;;  %p512_p2 = scmp.ne.s32.totalorder %s698_s15, 1 }
  0x2e   : > { %229 = vadd.xlane.f32.xlu1 %v223_v1  ;;  %225 = vadd.xlane.f32.xlu0 %v221_v2  ;;  %v222_v4 = vld [vmem:[%s179_s7 + $0x8] sm:$0xff] }
  0x30   : > { %v217_v6 = vld [vmem:[%s829_s9] sm:$0xff] }
  0x31   : > { %v218_v12 = vld [vmem:[%s829_s9 + $0x8] sm:$0xff] }
  0x32   : > { %v219_v5 = vld [vmem:[%s829_s9 + $0x10] sm:$0xff] }
  0x33   : > { %v220_v11 = vld [vmem:[%s829_s9 + $0x18] sm:$0xff] }
  0x36   : > { %231 = vadd.xlane.f32.xlu1 %v224_v3  ;;  %227 = vadd.xlane.f32.xlu0 %v222_v4 }
  0xa1   : > { %v230_v7 = vpop.xlane.xlu1 %229  ;;  %v226_v8 = vpop.xlane.xlu0 %225 }
  0xa2   : > { %v235_v9 = vadd.f32 %v230_v7, %v219_v5  ;;  %v233_v10 = vadd.f32 %v226_v8, %v217_v6 }
  0xa4   : > { %240 = vst.msk [vmem:[%s829_s9 + $0x10] sm:$0xff] %vm237_vm1, %v235_v9 }
  0xa5   : > { %238 = vst.msk [vmem:[%s829_s9] sm:$0xff] %vm237_vm1, %v233_v10 }
  0xa9   : > { %v232_v13 = vpop.xlane.xlu1 %231  ;;  %v228_v14 = vpop.xlane.xlu0 %227  ;;  %245 = sbr.rel (%p512_p2) target bundleno = 522 (0x20a), region = 44 }
  0xaa   : > { %v236_v15 = vadd.f32 %v232_v13, %v220_v11  ;;  %v234_v16 = vadd.f32 %v228_v14, %v218_v12 }
  0xac   : > { %241 = vst.msk [vmem:[%s829_s9 + $0x18] sm:$0xff] %vm237_vm1, %v236_v15 }
  0xad   : > { %239 = vst.msk [vmem:[%s829_s9 + $0x8] sm:$0xff] %vm237_vm1, %v234_v16 }
  0xae   : > { %v248_v18 = vld [vmem:[%s829_s9 + $0x10] sm:$0xff]  ;;  %v246_v22 = vld [vmem:[%s829_s9] sm:$0xff]  ;;  %vm259_vm2 = vcmask 261120   ;;  %v256_v42 = vld [vmem:[%s903_s2 + $0x8] sm:$0xff]  ;;  %vm302_vm7 = vcmask 64512  }
  0xaf   : > { %v252_v21 = vmul.f32 0.00390625, %v248_v18  ;;  %v250_v24 = vmul.f32 0.00390625, %v246_v22  ;;  %v254_v25 = vld [vmem:[%s902_s1] sm:$0xff]  ;;  %v258_v43 = vld [vmem:[%s903_s2 + $0x18] sm:$0xff]  ;;  %v257_v45 = vld [vmem:[%s903_s2 + $0x10] sm:$0xff] }
  0xb0   : > { %v255_v44 = vld [vmem:[%s903_s2] sm:$0xff] }
  0xb3   : > { %v249_v17 = vld [vmem:[%s829_s9 + $0x18] sm:$0xff] }
  0xb4   : > { %v247_v19 = vld [vmem:[%s829_s9 + $0x8] sm:$0xff]  ;;  %v253_v20 = vmul.f32 0.00390625, %v249_v17 }
  0xb5   : > { %v251_v23 = vmul.f32 0.00390625, %v247_v19 }
  0xb6   : > { %275 = vmatpush.msra.mxu0 %v253_v20 }
  0xb8   : > { %276 = vmatpush.msra.mxu0 %v252_v21 }
  0xba   : > { %277 = vmatpush.msra.mxu0 %v251_v23 }
  0xbc   : > { %278 = vmatpush.msra.mxu0 %v250_v24 }
  0xbd   : > { %513 = vmatmul.msk.f32.vlgmr.msra.gmra.mxu0 %vm259_vm2, %v254_v25 }
 0x13a   : > { %v280_v26 = vpop.f32.mrf.mxu0 }
 0x13b   : > { %v283_v27 = vsub.f32 0.0, %v280_v26 }
 0x13d   : > { %v284_v28 = vmul.f32 1.442695, %v283_v27 }
 0x13f   : > { %598 = vpow2.f32 %v284_v28 }
 0x145   : > { %v599_v29 = vpop.eup %598 }
 0x146   : > { %v286_v30 = vadd.f32 1.0, %v599_v29 }
 0x148   : > { %600 = vrcp.f32 %v286_v30  ;;  %v298_v34 = vand.u32 2147483648, %v286_v30  ;;  %v296_v36 = vand.u32 2147483647, %v286_v30  ;;  %vm292_vm4 = vweird.f32 %v286_v30 }
 0x14a   : > { %v299_v38 = vor.u32 1.1754944e-38, %v298_v34  ;;  %vm297_vm6 = vcmp.eq.f32.partialorder %v296_v36, 8.507059e+37 }
 0x14e   : > { %v601_v31 = vpop.eup %600 }
 0x14f   : > { %v288_v32 = vmul.f32 %v601_v31, %v286_v30  ;;  %vm293_vm3 = vweird.f32 %v601_v31 }
 0x150   : > { %vm294_vm5 = vmor %vm292_vm4, %vm293_vm3 }
 0x151   : > { %v289_v33 = vsub.f32 1.0, %v288_v32 }
 0x153   : > { %v290_v35 = vmul.f32 %v601_v31, %v289_v33 }
 0x155   : > { %v291_v37 = vadd.f32 %v601_v31, %v290_v35 }
 0x157   : > { %v295_v39 = vsel %vm294_vm5, %v601_v31, %v291_v37 }
 0x158   : > { %v300_v40 = vsel %vm297_vm6, %v299_v38, %v295_v39 }
 0x159   : > { %v301_v41 = vmul.f32 %v300_v40, %v280_v26 }
 0x15b   : > { %330 = vmatpush.msra.mxu1 %v301_v41  ;;  %521 = vmatpush.msra.mxu2 %v301_v41 }
 0x15c   : > { %522 = vmatpush.msra.mxu3 %v301_v41  ;;  %515 = vmatmul.msk.f32.vlgmr.msra.gmra.mxu2 %vm302_vm7, %v256_v42 }
 0x15d   : > { %517 = vmatmul.msk.f32.vlgmr.msra.gmra.mxu3 %vm302_vm7, %v258_v43  ;;  %514 = vmatmul.msk.f32.vlgmr.msra.gmra.mxu1 %vm302_vm7, %v255_v44 }
 0x164   : > { %516 = vmatmul.msk.f32.gmra.mxu2 %vm302_vm7, %v257_v45 }
 0x1da   : > { %v332_v46 = vpop.f32.mrf.mxu1 }
 0x1db   : > { %v344_v47 = vsub.f32 0.0, %v332_v46 }
 0x1dd   : > { %v348_v48 = vmul.f32 1.442695, %v344_v47 }
 0x1df   : > { %602 = vpow2.f32 %v348_v48  ;;  %v335_v49 = vpop.f32.mrf.mxu2 }
 0x1e0   : > { %v345_v50 = vsub.f32 0.0, %v335_v49  ;;  %v341_v51 = vpop.f32.mrf.mxu3 }
 0x1e1   : > { %v347_v52 = vsub.f32 0.0, %v341_v51 }
 0x1e2   : > { %v350_v53 = vmul.f32 1.442695, %v345_v50 }
 0x1e3   : > { %v354_v54 = vmul.f32 1.442695, %v347_v52 }
 0x1e4   : > { %604 = vpow2.f32 %v350_v53 }
 0x1e5   : > { %v603_v55 = vpop.eup %602  ;;  %606 = vpow2.f32 %v354_v54 }
 0x1e6   : > { %v356_v56 = vadd.f32 1.0, %v603_v55 }
 0x1e7   : > { %v338_v57 = vpop.f32.mrf.mxu2 }
 0x1e8   : > { %608 = vrcp.f32 %v356_v56  ;;  %v346_v58 = vsub.f32 0.0, %v338_v57  ;;  %v371_v2 = vand.u32 2147483648, %v356_v56  ;;  %vm365_vm8 = vweird.f32 %v356_v56 }
 0x1e9   : > { %v369_v4 = vand.u32 2147483647, %v356_v56 }
 0x1ea   : > { %v605_v59 = vpop.eup %604  ;;  %v352_v63 = vmul.f32 1.442695, %v346_v58  ;;  %v372_v8 = vor.u32 1.1754944e-38, %v371_v2 }
 0x1eb   : > { %v607_v60 = vpop.eup %606  ;;  %v357_v61 = vadd.f32 1.0, %v605_v59  ;;  %vm370_vm11 = vcmp.eq.f32.partialorder %v369_v4, 8.507059e+37 }
 0x1ec   : > { %v359_v62 = vadd.f32 1.0, %v607_v60 }
 0x1ed   : > { %610 = vrcp.f32 %v357_v61  ;;  %v383_v14 = vand.u32 2147483647, %v357_v61  ;;  %v385_v15 = vand.u32 2147483648, %v357_v61  ;;  %vm379_vm15 = vweird.f32 %v357_v61 }
 0x1ee   : > { %v609_v0 = vpop.eup %608  ;;  %612 = vrcp.f32 %v359_v62  ;;  %vm407_vm12 = vweird.f32 %v359_v62  ;;  %v413_v21 = vand.u32 2147483648, %v359_v62  ;;  %v411_v23 = vand.u32 2147483647, %v359_v62 }
 0x1ef   : > { %v361_v1 = vmul.f32 %v609_v0, %v356_v56  ;;  %614 = vpow2.f32 %v352_v63  ;;  %vm366_vm9 = vweird.f32 %v609_v0  ;;  %v386_v25 = vor.u32 1.1754944e-38, %v385_v15 }
 0x1f0   : > { %vm367_vm10 = vmor %vm365_vm8, %vm366_vm9  ;;  %vm384_vm2 = vcmp.eq.f32.partialorder %v383_v14, 8.507059e+37  ;;  %v414_v28 = vor.u32 1.1754944e-38, %v413_v21  ;;  %vm412_vm4 = vcmp.eq.f32.partialorder %v411_v23, 8.507059e+37 }
 0x1f1   : > { %v362_v3 = vsub.f32 1.0, %v361_v1 }
 0x1f3   : > { %v611_v5 = vpop.eup %610  ;;  %v363_v6 = vmul.f32 %v609_v0, %v362_v3 }
 0x1f4   : > { %v613_v7 = vpop.eup %612  ;;  %v375_v9 = vmul.f32 %v611_v5, %v357_v61  ;;  %vm380_vm13 = vweird.f32 %v611_v5 }
 0x1f5   : > { %v364_v10 = vadd.f32 %v609_v0, %v363_v6  ;;  %v403_v11 = vmul.f32 %v613_v7, %v359_v62  ;;  %v615_v12 = vpop.eup %614  ;;  %vm408_vm14 = vweird.f32 %v613_v7  ;;  %vm381_vm0 = vmor %vm379_vm15, %vm380_vm13 }
 0x1f6   : > { %v376_v13 = vsub.f32 1.0, %v375_v9  ;;  %v358_v18 = vadd.f32 1.0, %v615_v12  ;;  %vm409_vm3 = vmor %vm407_vm12, %vm408_vm14 }
 0x1f7   : > { %v368_v16 = vsel %vm367_vm10, %v609_v0, %v364_v10  ;;  %v404_v17 = vsub.f32 1.0, %v403_v11 }
 0x1f8   : > { %v373_v19 = vsel %vm370_vm11, %v372_v8, %v368_v16  ;;  %v377_v20 = vmul.f32 %v611_v5, %v376_v13  ;;  %616 = vrcp.f32 %v358_v18  ;;  %v399_v35 = vand.u32 2147483648, %v358_v18 }
 0x1f9   : > { %416 = vst.msk [vmem:[%s829_s9] sm:$0xff] %vm237_vm1, %v373_v19  ;;  %v405_v22 = vmul.f32 %v613_v7, %v404_v17  ;;  %v397_v37 = vand.u32 2147483647, %v358_v18  ;;  %vm393_vm6 = vweird.f32 %v358_v18 }
 0x1fa   : > { %v378_v24 = vadd.f32 %v611_v5, %v377_v20  ;;  %v400_v39 = vor.u32 1.1754944e-38, %v399_v35 }
 0x1fb   : > { %v406_v26 = vadd.f32 %v613_v7, %v405_v22  ;;  %vm398_vm8 = vcmp.eq.f32.partialorder %v397_v37, 8.507059e+37 }
 0x1fc   : > { %v382_v27 = vsel %vm381_vm0, %v611_v5, %v378_v24 }
 0x1fd   : > { %v387_v29 = vsel %vm384_vm2, %v386_v25, %v382_v27  ;;  %v410_v30 = vsel %vm409_vm3, %v613_v7, %v406_v26 }
 0x1fe   : > { %417 = vst.msk [vmem:[%s829_s9 + $0x8] sm:$0xff] %vm237_vm1, %v387_v29  ;;  %v415_v31 = vsel %vm412_vm4, %v414_v28, %v410_v30  ;;  %v617_v32 = vpop.eup %616 }
 0x1ff   : > { %419 = vst.msk [vmem:[%s829_s9 + $0x18] sm:$0xff] %vm237_vm1, %v415_v31  ;;  %v389_v33 = vmul.f32 %v617_v32, %v358_v18  ;;  %vm394_vm5 = vweird.f32 %v617_v32 }
 0x200   : > { %vm395_vm7 = vmor %vm393_vm6, %vm394_vm5 }
 0x201   : > { %v390_v34 = vsub.f32 1.0, %v389_v33 }
 0x203   : > { %v391_v36 = vmul.f32 %v617_v32, %v390_v34 }
 0x205   : > { %v392_v38 = vadd.f32 %v617_v32, %v391_v36 }
 0x207   : > { %v396_v40 = vsel %vm395_vm7, %v617_v32, %v392_v38 }
 0x208   : > { %v401_v41 = vsel %vm398_vm8, %v400_v39, %v396_v40 }
 0x209   : > { %418 = vst.msk [vmem:[%s829_s9 + $0x10] sm:$0xff] %vm237_vm1, %v401_v41 }
 0x20a PF: > { %s16_s19 = sadd.s32 1, %s714_s19   ;;  %s907_s12 = smov %s690_s13 }
 0x20b   : > { %p13_p3 = scmp.ge.s32.totalorder %s16_s19, 6   ;;  %s908_s13 = smov %s694_s14 }
 0x20c   : > { %s909_s14 = smov %s807_s5  ;;  %s910_s15 = smov %s706_s17 }
 0x20d   : > { %s911_s16 = smov %s710_s18  ;;  %s912_s17 = smov %s915_s21 }
 0x20e   : > { %s913_s18 = smov %s919_s22  ;;  %15 = sbr.rel (!%p13_p3) target bundleno = 5 (0x5), region = 80 }
 0x213   :  { %441 = vsyncpa [#allocation3], 1 }
 0x214   :  { %443 = vsyncpa [#allocation3 + $0x1], 1 }

</bundles_post_ra>
